<compile_context>
chip_gen: v6e
topology: v6e:2x2x1
jax: 0.10.0
libtpu: 0.0.40
codegen_flags: <defaults>
</compile_context>

<pallas_src>
import jax
import jax.numpy as jnp
from jax.experimental import pallas as pl
from jax.experimental.pallas import tpu as pltpu


def lstm_kernel(x_ref, wih_ref, whh_ref, b_ref, o_ref):
    # x_ref:   (T*B, D)  time-major flattened input (row t*B + b = step t, batch b)
    # wih_ref: (D, 4H)   input->gate weights  (transposed from PyTorch (4H, D))
    # whh_ref: (H, 4H)   hidden->gate weights (transposed from PyTorch (4H, H))
    # b_ref:   (1, 4H)   combined bias b_ih + b_hh
    # o_ref:   (B, H)    last hidden state h_T  (== h_n[-1] in PyTorch)
    tb, d = x_ref.shape
    h_dim, h4 = whh_ref.shape
    b_dim = o_ref.shape[0]
    t_steps = tb // b_dim

    # Single MXU matmul projecting ALL timesteps at once; 4H = 128 keeps the
    # result lane-dense.  Bias folded in here (one broadcast, outside the loop).
    xg = jnp.dot(x_ref[...], wih_ref[...],
                 preferred_element_type=jnp.float32) + b_ref[...]

    whh = whh_ref[...]

    def sigmoid(v):
        return 1.0 / (1.0 + jnp.exp(-v))

    h = jnp.zeros((b_dim, h_dim), dtype=jnp.float32)
    c = jnp.zeros((b_dim, h_dim), dtype=jnp.float32)

    # Sequential recurrence (inherent to LSTM).  T is small and static, so the
    # loop is fully unrolled: all slices are static, live data is a few vregs.
    for t in range(t_steps):
        gates = xg[t * b_dim:(t + 1) * b_dim, :] + jnp.dot(
            h, whh, preferred_element_type=jnp.float32)         # (B, 4H)
        i = sigmoid(gates[:, 0 * h_dim:1 * h_dim])               # input gate
        f = sigmoid(gates[:, 1 * h_dim:2 * h_dim])               # forget gate
        g = jnp.tanh(gates[:, 2 * h_dim:3 * h_dim])              # candidate
        o = sigmoid(gates[:, 3 * h_dim:4 * h_dim])               # output gate
        c = f * c + i * g
        h = o * jnp.tanh(c)

    o_ref[...] = h.astype(o_ref.dtype)


def lstm4_forward(x, w_ih, w_hh, b_ih, b_hh):
    """x: (B, T, input_size), batch_first.  Weights in PyTorch nn.LSTM layout:
    w_ih (4H, input_size), w_hh (4H, H), b_ih/b_hh (4H,), gate order i,f,g,o.
    Returns h_n[-1] of shape (B, H)."""
    bsz, t_steps, d = x.shape
    h4 = w_ih.shape[0]
    h_dim = h4 // 4

    # Layout glue only: time-major + flatten so the kernel runs one lane-dense
    # (T*B, D) @ (D, 4H) projection; transpose weights to (K, N) layout.
    x_tm = jnp.transpose(x, (1, 0, 2)).reshape(t_steps * bsz, d)
    wih_t = jnp.transpose(w_ih)                  # (D, 4H)
    whh_t = jnp.transpose(w_hh)                  # (H, 4H)
    bias = (b_ih + b_hh).reshape(1, h4)

    return pl.pallas_call(
        lstm_kernel,
        out_shape=jax.ShapeDtypeStruct((bsz, h_dim), x.dtype),
        grid_spec=pltpu.PrefetchScalarGridSpec(
            num_scalar_prefetch=0,
            grid=(1,),  # whole problem is a few tens of KB -> single grid step
            in_specs=[
                pl.BlockSpec((t_steps * bsz, d), lambda i: (0, 0)),
                pl.BlockSpec((d, h4), lambda i: (0, 0)),
                pl.BlockSpec((h_dim, h4), lambda i: (0, 0)),
                pl.BlockSpec((1, h4), lambda i: (0, 0)),
            ],
            out_specs=pl.BlockSpec((bsz, h_dim), lambda i: (0, 0)),
        ),
        compiler_params=pltpu.CompilerParams(
            dimension_semantics=("arbitrary",)),
    )(x_tm, wih_t, whh_t, bias)


if __name__ == "__main__":
    # Small deterministic config: batch=2, seq=8, input_size=32, hidden=32
    # (4*hidden = 128 -> gate matmuls are exactly one lane wide).
    B, T, D, H = 2, 8, 32, 32
    key = jax.random.PRNGKey(0)
    kx, k1, k2, k3, k4 = jax.random.split(key, 5)
    scale = 1.0 / float(jnp.sqrt(H))

    x = jax.random.normal(kx, (B, T, D), dtype=jnp.float32)
    w_ih = jax.random.uniform(k1, (4 * H, D), jnp.float32, -scale, scale)
    w_hh = jax.random.uniform(k2, (4 * H, H), jnp.float32, -scale, scale)
    b_ih = jax.random.uniform(k3, (4 * H,), jnp.float32, -scale, scale)
    b_hh = jax.random.uniform(k4, (4 * H,), jnp.float32, -scale, scale)

    y = lstm4_forward(x, w_ih, w_hh, b_ih, b_hh)
    y = jax.block_until_ready(y)

    # Pure-JAX reference with PyTorch nn.LSTM semantics (gate order i, f, g, o).
    def ref_lstm(x, w_ih, w_hh, b_ih, b_hh):
        bb, tt, _ = x.shape
        hh = w_hh.shape[1]
        sig = lambda v: 1.0 / (1.0 + jnp.exp(-v))
        h = jnp.zeros((bb, hh), jnp.float32)
        c = jnp.zeros((bb, hh), jnp.float32)
        for t in range(tt):
            gates = x[:, t, :] @ w_ih.T + b_ih + h @ w_hh.T + b_hh
            i = sig(gates[:, 0:hh])
            f = sig(gates[:, hh:2 * hh])
            g = jnp.tanh(gates[:, 2 * hh:3 * hh])
            o = sig(gates[:, 3 * hh:4 * hh])
            c = f * c + i * g
            h = o * jnp.tanh(c)
        return h

    ref = ref_lstm(x, w_ih, w_hh, b_ih, b_hh)
    assert y.shape == (B, H)
    assert jnp.allclose(y, ref, rtol=1e-4, atol=1e-4), float(jnp.max(jnp.abs(y - ref)))

    print("KERNEL_OK")
</pallas_src>

<mosaic_0001>
module attributes {stable_mosaic.version = 11 : i64} {
  func.func @lstm_kernel(%arg0: i32, %arg1: memref<16x32xf32, #tpu.memory_space<vmem>>, %arg2: memref<32x128xf32, #tpu.memory_space<vmem>>, %arg3: memref<32x128xf32, #tpu.memory_space<vmem>>, %arg4: memref<1x128xf32, #tpu.memory_space<vmem>>, %arg5: memref<2x32xf32, #tpu.memory_space<vmem>>) attributes {dimension_semantics = [#tpu.dimension_semantics<arbitrary>], iteration_bounds = array<i64: 1>, scalar_prefetch = 0 : i64, scratch_operands = 0 : i64, tpu.core_type = #tpu.core_type<tc>, window_params = [{pipeline_mode = #tpu.pipeline_mode<synchronous>, transform_indices = @transform_0, window_bounds = array<i64: 16, 32>}, {pipeline_mode = #tpu.pipeline_mode<synchronous>, transform_indices = @transform_1, window_bounds = array<i64: 32, 128>}, {pipeline_mode = #tpu.pipeline_mode<synchronous>, transform_indices = @transform_2, window_bounds = array<i64: 32, 128>}, {pipeline_mode = #tpu.pipeline_mode<synchronous>, transform_indices = @transform_3, window_bounds = array<i64: 1, 128>}, {pipeline_mode = #tpu.pipeline_mode<synchronous>, transform_indices = @transform_4, window_bounds = array<i64: 2, 32>}]} {
    %c0 = arith.constant 0 : index
    %c0_0 = arith.constant 0 : index
    %0 = vector.load %arg1[%c0, %c0_0] : memref<16x32xf32, #tpu.memory_space<vmem>>, vector<16x32xf32>
    %c0_1 = arith.constant 0 : index
    %c0_2 = arith.constant 0 : index
    %1 = vector.load %arg2[%c0_1, %c0_2] : memref<32x128xf32, #tpu.memory_space<vmem>>, vector<32x128xf32>
    %cst = arith.constant dense<0.000000e+00> : vector<16x128xf32>
    %2 = tpu.matmul %0, %1, %cst {dimension_numbers = #tpu.dot_dimension_numbers<[1], [0], [0], [1], [0, 0, 1, 1], [], []>} : vector<16x32xf32>, vector<32x128xf32>, vector<16x128xf32> -> vector<16x128xf32>
    %c0_3 = arith.constant 0 : index
    %c0_4 = arith.constant 0 : index
    %3 = vector.load %arg4[%c0_3, %c0_4] : memref<1x128xf32, #tpu.memory_space<vmem>>, vector<1x128xf32>
    %4 = vector.broadcast %3 : vector<1x128xf32> to vector<16x128xf32>
    %5 = arith.addf %2, %4 : vector<16x128xf32>
    %c0_5 = arith.constant 0 : index
    %c0_6 = arith.constant 0 : index
    %6 = vector.load %arg3[%c0_5, %c0_6] : memref<32x128xf32, #tpu.memory_space<vmem>>, vector<32x128xf32>
    %cst_7 = arith.constant 0.000000e+00 : f32
    %7 = vector.broadcast %cst_7 : f32 to vector<2x32xf32>
    %cst_8 = arith.constant 0.000000e+00 : f32
    %8 = vector.broadcast %cst_8 : f32 to vector<2x32xf32>
    %9 = vector.extract_strided_slice %5 {offsets = [0, 0], sizes = [2, 128], strides = [1, 1]} : vector<16x128xf32> to vector<2x128xf32>
    %cst_9 = arith.constant dense<0.000000e+00> : vector<2x128xf32>
    %10 = tpu.matmul %7, %6, %cst_9 {dimension_numbers = #tpu.dot_dimension_numbers<[1], [0], [0], [1], [0, 0, 1, 1], [], []>} : vector<2x32xf32>, vector<32x128xf32>, vector<2x128xf32> -> vector<2x128xf32>
    %11 = arith.addf %9, %10 : vector<2x128xf32>
    %12 = vector.extract_strided_slice %11 {offsets = [0, 0], sizes = [2, 32], strides = [1, 1]} : vector<2x128xf32> to vector<2x32xf32>
    %cst_10 = arith.constant 0.000000e+00 : f32
    %13 = vector.broadcast %cst_10 : f32 to vector<2x32xf32>
    %14 = arith.subf %13, %12 : vector<2x32xf32>
    %15 = math.exp %14 : vector<2x32xf32>
    %cst_11 = arith.constant 1.000000e+00 : f32
    %16 = vector.broadcast %cst_11 : f32 to vector<2x32xf32>
    %17 = arith.addf %16, %15 : vector<2x32xf32>
    %cst_12 = arith.constant 1.000000e+00 : f32
    %18 = vector.broadcast %cst_12 : f32 to vector<2x32xf32>
    %19 = arith.divf %18, %17 : vector<2x32xf32>
    %20 = vector.extract_strided_slice %11 {offsets = [0, 32], sizes = [2, 32], strides = [1, 1]} : vector<2x128xf32> to vector<2x32xf32>
    %cst_13 = arith.constant 0.000000e+00 : f32
    %21 = vector.broadcast %cst_13 : f32 to vector<2x32xf32>
    %22 = arith.subf %21, %20 : vector<2x32xf32>
    %23 = math.exp %22 : vector<2x32xf32>
    %cst_14 = arith.constant 1.000000e+00 : f32
    %24 = vector.broadcast %cst_14 : f32 to vector<2x32xf32>
    %25 = arith.addf %24, %23 : vector<2x32xf32>
    %cst_15 = arith.constant 1.000000e+00 : f32
    %26 = vector.broadcast %cst_15 : f32 to vector<2x32xf32>
    %27 = arith.divf %26, %25 : vector<2x32xf32>
    %28 = vector.extract_strided_slice %11 {offsets = [0, 64], sizes = [2, 32], strides = [1, 1]} : vector<2x128xf32> to vector<2x32xf32>
    %29 = math.tanh %28 : vector<2x32xf32>
    %30 = vector.extract_strided_slice %11 {offsets = [0, 96], sizes = [2, 32], strides = [1, 1]} : vector<2x128xf32> to vector<2x32xf32>
    %cst_16 = arith.constant 0.000000e+00 : f32
    %31 = vector.broadcast %cst_16 : f32 to vector<2x32xf32>
    %32 = arith.subf %31, %30 : vector<2x32xf32>
    %33 = math.exp %32 : vector<2x32xf32>
    %cst_17 = arith.constant 1.000000e+00 : f32
    %34 = vector.broadcast %cst_17 : f32 to vector<2x32xf32>
    %35 = arith.addf %34, %33 : vector<2x32xf32>
    %cst_18 = arith.constant 1.000000e+00 : f32
    %36 = vector.broadcast %cst_18 : f32 to vector<2x32xf32>
    %37 = arith.divf %36, %35 : vector<2x32xf32>
    %38 = arith.mulf %27, %8 : vector<2x32xf32>
    %39 = arith.mulf %19, %29 : vector<2x32xf32>
    %40 = arith.addf %38, %39 : vector<2x32xf32>
    %41 = math.tanh %40 : vector<2x32xf32>
    %42 = arith.mulf %37, %41 : vector<2x32xf32>
    %43 = vector.extract_strided_slice %5 {offsets = [2, 0], sizes = [2, 128], strides = [1, 1]} : vector<16x128xf32> to vector<2x128xf32>
    %cst_19 = arith.constant dense<0.000000e+00> : vector<2x128xf32>
    %44 = tpu.matmul %42, %6, %cst_19 {dimension_numbers = #tpu.dot_dimension_numbers<[1], [0], [0], [1], [0, 0, 1, 1], [], []>} : vector<2x32xf32>, vector<32x128xf32>, vector<2x128xf32> -> vector<2x128xf32>
    %45 = arith.addf %43, %44 : vector<2x128xf32>
    %46 = vector.extract_strided_slice %45 {offsets = [0, 0], sizes = [2, 32], strides = [1, 1]} : vector<2x128xf32> to vector<2x32xf32>
    %cst_20 = arith.constant 0.000000e+00 : f32
    %47 = vector.broadcast %cst_20 : f32 to vector<2x32xf32>
    %48 = arith.subf %47, %46 : vector<2x32xf32>
    %49 = math.exp %48 : vector<2x32xf32>
    %cst_21 = arith.constant 1.000000e+00 : f32
    %50 = vector.broadcast %cst_21 : f32 to vector<2x32xf32>
    %51 = arith.addf %50, %49 : vector<2x32xf32>
    %cst_22 = arith.constant 1.000000e+00 : f32
    %52 = vector.broadcast %cst_22 : f32 to vector<2x32xf32>
    %53 = arith.divf %52, %51 : vector<2x32xf32>
    %54 = vector.extract_strided_slice %45 {offsets = [0, 32], sizes = [2, 32], strides = [1, 1]} : vector<2x128xf32> to vector<2x32xf32>
    %cst_23 = arith.constant 0.000000e+00 : f32
    %55 = vector.broadcast %cst_23 : f32 to vector<2x32xf32>
    %56 = arith.subf %55, %54 : vector<2x32xf32>
    %57 = math.exp %56 : vector<2x32xf32>
    %cst_24 = arith.constant 1.000000e+00 : f32
    %58 = vector.broadcast %cst_24 : f32 to vector<2x32xf32>
    %59 = arith.addf %58, %57 : vector<2x32xf32>
    %cst_25 = arith.constant 1.000000e+00 : f32
    %60 = vector.broadcast %cst_25 : f32 to vector<2x32xf32>
    %61 = arith.divf %60, %59 : vector<2x32xf32>
    %62 = vector.extract_strided_slice %45 {offsets = [0, 64], sizes = [2, 32], strides = [1, 1]} : vector<2x128xf32> to vector<2x32xf32>
    %63 = math.tanh %62 : vector<2x32xf32>
    %64 = vector.extract_strided_slice %45 {offsets = [0, 96], sizes = [2, 32], strides = [1, 1]} : vector<2x128xf32> to vector<2x32xf32>
    %cst_26 = arith.constant 0.000000e+00 : f32
    %65 = vector.broadcast %cst_26 : f32 to vector<2x32xf32>
    %66 = arith.subf %65, %64 : vector<2x32xf32>
    %67 = math.exp %66 : vector<2x32xf32>
    %cst_27 = arith.constant 1.000000e+00 : f32
    %68 = vector.broadcast %cst_27 : f32 to vector<2x32xf32>
    %69 = arith.addf %68, %67 : vector<2x32xf32>
    %cst_28 = arith.constant 1.000000e+00 : f32
    %70 = vector.broadcast %cst_28 : f32 to vector<2x32xf32>
    %71 = arith.divf %70, %69 : vector<2x32xf32>
    %72 = arith.mulf %61, %40 : vector<2x32xf32>
    %73 = arith.mulf %53, %63 : vector<2x32xf32>
    %74 = arith.addf %72, %73 : vector<2x32xf32>
    %75 = math.tanh %74 : vector<2x32xf32>
    %76 = arith.mulf %71, %75 : vector<2x32xf32>
    %77 = vector.extract_strided_slice %5 {offsets = [4, 0], sizes = [2, 128], strides = [1, 1]} : vector<16x128xf32> to vector<2x128xf32>
    %cst_29 = arith.constant dense<0.000000e+00> : vector<2x128xf32>
    %78 = tpu.matmul %76, %6, %cst_29 {dimension_numbers = #tpu.dot_dimension_numbers<[1], [0], [0], [1], [0, 0, 1, 1], [], []>} : vector<2x32xf32>, vector<32x128xf32>, vector<2x128xf32> -> vector<2x128xf32>
    %79 = arith.addf %77, %78 : vector<2x128xf32>
    %80 = vector.extract_strided_slice %79 {offsets = [0, 0], sizes = [2, 32], strides = [1, 1]} : vector<2x128xf32> to vector<2x32xf32>
    %cst_30 = arith.constant 0.000000e+00 : f32
    %81 = vector.broadcast %cst_30 : f32 to vector<2x32xf32>
    %82 = arith.subf %81, %80 : vector<2x32xf32>
    %83 = math.exp %82 : vector<2x32xf32>
    %cst_31 = arith.constant 1.000000e+00 : f32
    %84 = vector.broadcast %cst_31 : f32 to vector<2x32xf32>
    %85 = arith.addf %84, %83 : vector<2x32xf32>
    %cst_32 = arith.constant 1.000000e+00 : f32
    %86 = vector.broadcast %cst_32 : f32 to vector<2x32xf32>
    %87 = arith.divf %86, %85 : vector<2x32xf32>
    %88 = vector.extract_strided_slice %79 {offsets = [0, 32], sizes = [2, 32], strides = [1, 1]} : vector<2x128xf32> to vector<2x32xf32>
    %cst_33 = arith.constant 0.000000e+00 : f32
    %89 = vector.broadcast %cst_33 : f32 to vector<2x32xf32>
    %90 = arith.subf %89, %88 : vector<2x32xf32>
    %91 = math.exp %90 : vector<2x32xf32>
    %cst_34 = arith.constant 1.000000e+00 : f32
    %92 = vector.broadcast %cst_34 : f32 to vector<2x32xf32>
    %93 = arith.addf %92, %91 : vector<2x32xf32>
    %cst_35 = arith.constant 1.000000e+00 : f32
    %94 = vector.broadcast %cst_35 : f32 to vector<2x32xf32>
    %95 = arith.divf %94, %93 : vector<2x32xf32>
    %96 = vector.extract_strided_slice %79 {offsets = [0, 64], sizes = [2, 32], strides = [1, 1]} : vector<2x128xf32> to vector<2x32xf32>
    %97 = math.tanh %96 : vector<2x32xf32>
    %98 = vector.extract_strided_slice %79 {offsets = [0, 96], sizes = [2, 32], strides = [1, 1]} : vector<2x128xf32> to vector<2x32xf32>
    %cst_36 = arith.constant 0.000000e+00 : f32
    %99 = vector.broadcast %cst_36 : f32 to vector<2x32xf32>
    %100 = arith.subf %99, %98 : vector<2x32xf32>
    %101 = math.exp %100 : vector<2x32xf32>
    %cst_37 = arith.constant 1.000000e+00 : f32
    %102 = vector.broadcast %cst_37 : f32 to vector<2x32xf32>
    %103 = arith.addf %102, %101 : vector<2x32xf32>
    %cst_38 = arith.constant 1.000000e+00 : f32
    %104 = vector.broadcast %cst_38 : f32 to vector<2x32xf32>
    %105 = arith.divf %104, %103 : vector<2x32xf32>
    %106 = arith.mulf %95, %74 : vector<2x32xf32>
    %107 = arith.mulf %87, %97 : vector<2x32xf32>
    %108 = arith.addf %106, %107 : vector<2x32xf32>
    %109 = math.tanh %108 : vector<2x32xf32>
    %110 = arith.mulf %105, %109 : vector<2x32xf32>
    %111 = vector.extract_strided_slice %5 {offsets = [6, 0], sizes = [2, 128], strides = [1, 1]} : vector<16x128xf32> to vector<2x128xf32>
    %cst_39 = arith.constant dense<0.000000e+00> : vector<2x128xf32>
    %112 = tpu.matmul %110, %6, %cst_39 {dimension_numbers = #tpu.dot_dimension_numbers<[1], [0], [0], [1], [0, 0, 1, 1], [], []>} : vector<2x32xf32>, vector<32x128xf32>, vector<2x128xf32> -> vector<2x128xf32>
    %113 = arith.addf %111, %112 : vector<2x128xf32>
    %114 = vector.extract_strided_slice %113 {offsets = [0, 0], sizes = [2, 32], strides = [1, 1]} : vector<2x128xf32> to vector<2x32xf32>
    %cst_40 = arith.constant 0.000000e+00 : f32
    %115 = vector.broadcast %cst_40 : f32 to vector<2x32xf32>
    %116 = arith.subf %115, %114 : vector<2x32xf32>
    %117 = math.exp %116 : vector<2x32xf32>
    %cst_41 = arith.constant 1.000000e+00 : f32
    %118 = vector.broadcast %cst_41 : f32 to vector<2x32xf32>
    %119 = arith.addf %118, %117 : vector<2x32xf32>
    %cst_42 = arith.constant 1.000000e+00 : f32
    %120 = vector.broadcast %cst_42 : f32 to vector<2x32xf32>
    %121 = arith.divf %120, %119 : vector<2x32xf32>
    %122 = vector.extract_strided_slice %113 {offsets = [0, 32], sizes = [2, 32], strides = [1, 1]} : vector<2x128xf32> to vector<2x32xf32>
    %cst_43 = arith.constant 0.000000e+00 : f32
    %123 = vector.broadcast %cst_43 : f32 to vector<2x32xf32>
    %124 = arith.subf %123, %122 : vector<2x32xf32>
    %125 = math.exp %124 : vector<2x32xf32>
    %cst_44 = arith.constant 1.000000e+00 : f32
    %126 = vector.broadcast %cst_44 : f32 to vector<2x32xf32>
    %127 = arith.addf %126, %125 : vector<2x32xf32>
    %cst_45 = arith.constant 1.000000e+00 : f32
    %128 = vector.broadcast %cst_45 : f32 to vector<2x32xf32>
    %129 = arith.divf %128, %127 : vector<2x32xf32>
    %130 = vector.extract_strided_slice %113 {offsets = [0, 64], sizes = [2, 32], strides = [1, 1]} : vector<2x128xf32> to vector<2x32xf32>
    %131 = math.tanh %130 : vector<2x32xf32>
    %132 = vector.extract_strided_slice %113 {offsets = [0, 96], sizes = [2, 32], strides = [1, 1]} : vector<2x128xf32> to vector<2x32xf32>
    %cst_46 = arith.constant 0.000000e+00 : f32
    %133 = vector.broadcast %cst_46 : f32 to vector<2x32xf32>
    %134 = arith.subf %133, %132 : vector<2x32xf32>
    %135 = math.exp %134 : vector<2x32xf32>
    %cst_47 = arith.constant 1.000000e+00 : f32
    %136 = vector.broadcast %cst_47 : f32 to vector<2x32xf32>
    %137 = arith.addf %136, %135 : vector<2x32xf32>
    %cst_48 = arith.constant 1.000000e+00 : f32
    %138 = vector.broadcast %cst_48 : f32 to vector<2x32xf32>
    %139 = arith.divf %138, %137 : vector<2x32xf32>
    %140 = arith.mulf %129, %108 : vector<2x32xf32>
    %141 = arith.mulf %121, %131 : vector<2x32xf32>
    %142 = arith.addf %140, %141 : vector<2x32xf32>
    %143 = math.tanh %142 : vector<2x32xf32>
    %144 = arith.mulf %139, %143 : vector<2x32xf32>
    %145 = vector.extract_strided_slice %5 {offsets = [8, 0], sizes = [2, 128], strides = [1, 1]} : vector<16x128xf32> to vector<2x128xf32>
    %cst_49 = arith.constant dense<0.000000e+00> : vector<2x128xf32>
    %146 = tpu.matmul %144, %6, %cst_49 {dimension_numbers = #tpu.dot_dimension_numbers<[1], [0], [0], [1], [0, 0, 1, 1], [], []>} : vector<2x32xf32>, vector<32x128xf32>, vector<2x128xf32> -> vector<2x128xf32>
    %147 = arith.addf %145, %146 : vector<2x128xf32>
    %148 = vector.extract_strided_slice %147 {offsets = [0, 0], sizes = [2, 32], strides = [1, 1]} : vector<2x128xf32> to vector<2x32xf32>
    %cst_50 = arith.constant 0.000000e+00 : f32
    %149 = vector.broadcast %cst_50 : f32 to vector<2x32xf32>
    %150 = arith.subf %149, %148 : vector<2x32xf32>
    %151 = math.exp %150 : vector<2x32xf32>
    %cst_51 = arith.constant 1.000000e+00 : f32
    %152 = vector.broadcast %cst_51 : f32 to vector<2x32xf32>
    %153 = arith.addf %152, %151 : vector<2x32xf32>
    %cst_52 = arith.constant 1.000000e+00 : f32
    %154 = vector.broadcast %cst_52 : f32 to vector<2x32xf32>
    %155 = arith.divf %154, %153 : vector<2x32xf32>
    %156 = vector.extract_strided_slice %147 {offsets = [0, 32], sizes = [2, 32], strides = [1, 1]} : vector<2x128xf32> to vector<2x32xf32>
    %cst_53 = arith.constant 0.000000e+00 : f32
    %157 = vector.broadcast %cst_53 : f32 to vector<2x32xf32>
    %158 = arith.subf %157, %156 : vector<2x32xf32>
    %159 = math.exp %158 : vector<2x32xf32>
    %cst_54 = arith.constant 1.000000e+00 : f32
    %160 = vector.broadcast %cst_54 : f32 to vector<2x32xf32>
    %161 = arith.addf %160, %159 : vector<2x32xf32>
    %cst_55 = arith.constant 1.000000e+00 : f32
    %162 = vector.broadcast %cst_55 : f32 to vector<2x32xf32>
    %163 = arith.divf %162, %161 : vector<2x32xf32>
    %164 = vector.extract_strided_slice %147 {offsets = [0, 64], sizes = [2, 32], strides = [1, 1]} : vector<2x128xf32> to vector<2x32xf32>
    %165 = math.tanh %164 : vector<2x32xf32>
    %166 = vector.extract_strided_slice %147 {offsets = [0, 96], sizes = [2, 32], strides = [1, 1]} : vector<2x128xf32> to vector<2x32xf32>
    %cst_56 = arith.constant 0.000000e+00 : f32
    %167 = vector.broadcast %cst_56 : f32 to vector<2x32xf32>
    %168 = arith.subf %167, %166 : vector<2x32xf32>
    %169 = math.exp %168 : vector<2x32xf32>
    %cst_57 = arith.constant 1.000000e+00 : f32
    %170 = vector.broadcast %cst_57 : f32 to vector<2x32xf32>
    %171 = arith.addf %170, %169 : vector<2x32xf32>
    %cst_58 = arith.constant 1.000000e+00 : f32
    %172 = vector.broadcast %cst_58 : f32 to vector<2x32xf32>
    %173 = arith.divf %172, %171 : vector<2x32xf32>
    %174 = arith.mulf %163, %142 : vector<2x32xf32>
    %175 = arith.mulf %155, %165 : vector<2x32xf32>
    %176 = arith.addf %174, %175 : vector<2x32xf32>
    %177 = math.tanh %176 : vector<2x32xf32>
    %178 = arith.mulf %173, %177 : vector<2x32xf32>
    %179 = vector.extract_strided_slice %5 {offsets = [10, 0], sizes = [2, 128], strides = [1, 1]} : vector<16x128xf32> to vector<2x128xf32>
    %cst_59 = arith.constant dense<0.000000e+00> : vector<2x128xf32>
    %180 = tpu.matmul %178, %6, %cst_59 {dimension_numbers = #tpu.dot_dimension_numbers<[1], [0], [0], [1], [0, 0, 1, 1], [], []>} : vector<2x32xf32>, vector<32x128xf32>, vector<2x128xf32> -> vector<2x128xf32>
    %181 = arith.addf %179, %180 : vector<2x128xf32>
    %182 = vector.extract_strided_slice %181 {offsets = [0, 0], sizes = [2, 32], strides = [1, 1]} : vector<2x128xf32> to vector<2x32xf32>
    %cst_60 = arith.constant 0.000000e+00 : f32
    %183 = vector.broadcast %cst_60 : f32 to vector<2x32xf32>
    %184 = arith.subf %183, %182 : vector<2x32xf32>
    %185 = math.exp %184 : vector<2x32xf32>
    %cst_61 = arith.constant 1.000000e+00 : f32
    %186 = vector.broadcast %cst_61 : f32 to vector<2x32xf32>
    %187 = arith.addf %186, %185 : vector<2x32xf32>
    %cst_62 = arith.constant 1.000000e+00 : f32
    %188 = vector.broadcast %cst_62 : f32 to vector<2x32xf32>
    %189 = arith.divf %188, %187 : vector<2x32xf32>
    %190 = vector.extract_strided_slice %181 {offsets = [0, 32], sizes = [2, 32], strides = [1, 1]} : vector<2x128xf32> to vector<2x32xf32>
    %cst_63 = arith.constant 0.000000e+00 : f32
    %191 = vector.broadcast %cst_63 : f32 to vector<2x32xf32>
    %192 = arith.subf %191, %190 : vector<2x32xf32>
    %193 = math.exp %192 : vector<2x32xf32>
    %cst_64 = arith.constant 1.000000e+00 : f32
    %194 = vector.broadcast %cst_64 : f32 to vector<2x32xf32>
    %195 = arith.addf %194, %193 : vector<2x32xf32>
    %cst_65 = arith.constant 1.000000e+00 : f32
    %196 = vector.broadcast %cst_65 : f32 to vector<2x32xf32>
    %197 = arith.divf %196, %195 : vector<2x32xf32>
    %198 = vector.extract_strided_slice %181 {offsets = [0, 64], sizes = [2, 32], strides = [1, 1]} : vector<2x128xf32> to vector<2x32xf32>
    %199 = math.tanh %198 : vector<2x32xf32>
    %200 = vector.extract_strided_slice %181 {offsets = [0, 96], sizes = [2, 32], strides = [1, 1]} : vector<2x128xf32> to vector<2x32xf32>
    %cst_66 = arith.constant 0.000000e+00 : f32
    %201 = vector.broadcast %cst_66 : f32 to vector<2x32xf32>
    %202 = arith.subf %201, %200 : vector<2x32xf32>
    %203 = math.exp %202 : vector<2x32xf32>
    %cst_67 = arith.constant 1.000000e+00 : f32
    %204 = vector.broadcast %cst_67 : f32 to vector<2x32xf32>
    %205 = arith.addf %204, %203 : vector<2x32xf32>
    %cst_68 = arith.constant 1.000000e+00 : f32
    %206 = vector.broadcast %cst_68 : f32 to vector<2x32xf32>
    %207 = arith.divf %206, %205 : vector<2x32xf32>
    %208 = arith.mulf %197, %176 : vector<2x32xf32>
    %209 = arith.mulf %189, %199 : vector<2x32xf32>
    %210 = arith.addf %208, %209 : vector<2x32xf32>
    %211 = math.tanh %210 : vector<2x32xf32>
    %212 = arith.mulf %207, %211 : vector<2x32xf32>
    %213 = vector.extract_strided_slice %5 {offsets = [12, 0], sizes = [2, 128], strides = [1, 1]} : vector<16x128xf32> to vector<2x128xf32>
    %cst_69 = arith.constant dense<0.000000e+00> : vector<2x128xf32>
    %214 = tpu.matmul %212, %6, %cst_69 {dimension_numbers = #tpu.dot_dimension_numbers<[1], [0], [0], [1], [0, 0, 1, 1], [], []>} : vector<2x32xf32>, vector<32x128xf32>, vector<2x128xf32> -> vector<2x128xf32>
    %215 = arith.addf %213, %214 : vector<2x128xf32>
    %216 = vector.extract_strided_slice %215 {offsets = [0, 0], sizes = [2, 32], strides = [1, 1]} : vector<2x128xf32> to vector<2x32xf32>
    %cst_70 = arith.constant 0.000000e+00 : f32
    %217 = vector.broadcast %cst_70 : f32 to vector<2x32xf32>
    %218 = arith.subf %217, %216 : vector<2x32xf32>
    %219 = math.exp %218 : vector<2x32xf32>
    %cst_71 = arith.constant 1.000000e+00 : f32
    %220 = vector.broadcast %cst_71 : f32 to vector<2x32xf32>
    %221 = arith.addf %220, %219 : vector<2x32xf32>
    %cst_72 = arith.constant 1.000000e+00 : f32
    %222 = vector.broadcast %cst_72 : f32 to vector<2x32xf32>
    %223 = arith.divf %222, %221 : vector<2x32xf32>
    %224 = vector.extract_strided_slice %215 {offsets = [0, 32], sizes = [2, 32], strides = [1, 1]} : vector<2x128xf32> to vector<2x32xf32>
    %cst_73 = arith.constant 0.000000e+00 : f32
    %225 = vector.broadcast %cst_73 : f32 to vector<2x32xf32>
    %226 = arith.subf %225, %224 : vector<2x32xf32>
    %227 = math.exp %226 : vector<2x32xf32>
    %cst_74 = arith.constant 1.000000e+00 : f32
    %228 = vector.broadcast %cst_74 : f32 to vector<2x32xf32>
    %229 = arith.addf %228, %227 : vector<2x32xf32>
    %cst_75 = arith.constant 1.000000e+00 : f32
    %230 = vector.broadcast %cst_75 : f32 to vector<2x32xf32>
    %231 = arith.divf %230, %229 : vector<2x32xf32>
    %232 = vector.extract_strided_slice %215 {offsets = [0, 64], sizes = [2, 32], strides = [1, 1]} : vector<2x128xf32> to vector<2x32xf32>
    %233 = math.tanh %232 : vector<2x32xf32>
    %234 = vector.extract_strided_slice %215 {offsets = [0, 96], sizes = [2, 32], strides = [1, 1]} : vector<2x128xf32> to vector<2x32xf32>
    %cst_76 = arith.constant 0.000000e+00 : f32
    %235 = vector.broadcast %cst_76 : f32 to vector<2x32xf32>
    %236 = arith.subf %235, %234 : vector<2x32xf32>
    %237 = math.exp %236 : vector<2x32xf32>
    %cst_77 = arith.constant 1.000000e+00 : f32
    %238 = vector.broadcast %cst_77 : f32 to vector<2x32xf32>
    %239 = arith.addf %238, %237 : vector<2x32xf32>
    %cst_78 = arith.constant 1.000000e+00 : f32
    %240 = vector.broadcast %cst_78 : f32 to vector<2x32xf32>
    %241 = arith.divf %240, %239 : vector<2x32xf32>
    %242 = arith.mulf %231, %210 : vector<2x32xf32>
    %243 = arith.mulf %223, %233 : vector<2x32xf32>
    %244 = arith.addf %242, %243 : vector<2x32xf32>
    %245 = math.tanh %244 : vector<2x32xf32>
    %246 = arith.mulf %241, %245 : vector<2x32xf32>
    %247 = vector.extract_strided_slice %5 {offsets = [14, 0], sizes = [2, 128], strides = [1, 1]} : vector<16x128xf32> to vector<2x128xf32>
    %cst_79 = arith.constant dense<0.000000e+00> : vector<2x128xf32>
    %248 = tpu.matmul %246, %6, %cst_79 {dimension_numbers = #tpu.dot_dimension_numbers<[1], [0], [0], [1], [0, 0, 1, 1], [], []>} : vector<2x32xf32>, vector<32x128xf32>, vector<2x128xf32> -> vector<2x128xf32>
    %249 = arith.addf %247, %248 : vector<2x128xf32>
    %250 = vector.extract_strided_slice %249 {offsets = [0, 0], sizes = [2, 32], strides = [1, 1]} : vector<2x128xf32> to vector<2x32xf32>
    %cst_80 = arith.constant 0.000000e+00 : f32
    %251 = vector.broadcast %cst_80 : f32 to vector<2x32xf32>
    %252 = arith.subf %251, %250 : vector<2x32xf32>
    %253 = math.exp %252 : vector<2x32xf32>
    %cst_81 = arith.constant 1.000000e+00 : f32
    %254 = vector.broadcast %cst_81 : f32 to vector<2x32xf32>
    %255 = arith.addf %254, %253 : vector<2x32xf32>
    %cst_82 = arith.constant 1.000000e+00 : f32
    %256 = vector.broadcast %cst_82 : f32 to vector<2x32xf32>
    %257 = arith.divf %256, %255 : vector<2x32xf32>
    %258 = vector.extract_strided_slice %249 {offsets = [0, 32], sizes = [2, 32], strides = [1, 1]} : vector<2x128xf32> to vector<2x32xf32>
    %cst_83 = arith.constant 0.000000e+00 : f32
    %259 = vector.broadcast %cst_83 : f32 to vector<2x32xf32>
    %260 = arith.subf %259, %258 : vector<2x32xf32>
    %261 = math.exp %260 : vector<2x32xf32>
    %cst_84 = arith.constant 1.000000e+00 : f32
    %262 = vector.broadcast %cst_84 : f32 to vector<2x32xf32>
    %263 = arith.addf %262, %261 : vector<2x32xf32>
    %cst_85 = arith.constant 1.000000e+00 : f32
    %264 = vector.broadcast %cst_85 : f32 to vector<2x32xf32>
    %265 = arith.divf %264, %263 : vector<2x32xf32>
    %266 = vector.extract_strided_slice %249 {offsets = [0, 64], sizes = [2, 32], strides = [1, 1]} : vector<2x128xf32> to vector<2x32xf32>
    %267 = math.tanh %266 : vector<2x32xf32>
    %268 = vector.extract_strided_slice %249 {offsets = [0, 96], sizes = [2, 32], strides = [1, 1]} : vector<2x128xf32> to vector<2x32xf32>
    %cst_86 = arith.constant 0.000000e+00 : f32
    %269 = vector.broadcast %cst_86 : f32 to vector<2x32xf32>
    %270 = arith.subf %269, %268 : vector<2x32xf32>
    %271 = math.exp %270 : vector<2x32xf32>
    %cst_87 = arith.constant 1.000000e+00 : f32
    %272 = vector.broadcast %cst_87 : f32 to vector<2x32xf32>
    %273 = arith.addf %272, %271 : vector<2x32xf32>
    %cst_88 = arith.constant 1.000000e+00 : f32
    %274 = vector.broadcast %cst_88 : f32 to vector<2x32xf32>
    %275 = arith.divf %274, %273 : vector<2x32xf32>
    %276 = arith.mulf %265, %244 : vector<2x32xf32>
    %277 = arith.mulf %257, %267 : vector<2x32xf32>
    %278 = arith.addf %276, %277 : vector<2x32xf32>
    %279 = math.tanh %278 : vector<2x32xf32>
    %280 = arith.mulf %275, %279 : vector<2x32xf32>
    %c0_89 = arith.constant 0 : index
    %c0_90 = arith.constant 0 : index
    %281 = vector.load %arg5[%c0_89, %c0_90] : memref<2x32xf32, #tpu.memory_space<vmem>>, vector<2x32xf32>
    tpu.vector_store %arg5[%c0_89, %c0_90], %280 {strides = array<i32>} : memref<2x32xf32, #tpu.memory_space<vmem>>, vector<2x32xf32>,
    return
  }
  func.func @transform_0(%arg0: i32) -> (i32, i32) {
    %c0_i32 = arith.constant 0 : i32
    %c0_i32_0 = arith.constant 0 : i32
    %c0_i32_1 = arith.constant 0 : i32
    return %c0_i32, %c0_i32_0 : i32, i32
  }
  func.func @transform_1(%arg0: i32) -> (i32, i32) {
    %c0_i32 = arith.constant 0 : i32
    %c0_i32_0 = arith.constant 0 : i32
    %c0_i32_1 = arith.constant 0 : i32
    return %c0_i32, %c0_i32_0 : i32, i32
  }
  func.func @transform_2(%arg0: i32) -> (i32, i32) {
    %c0_i32 = arith.constant 0 : i32
    %c0_i32_0 = arith.constant 0 : i32
    %c0_i32_1 = arith.constant 0 : i32
    return %c0_i32, %c0_i32_0 : i32, i32
  }
  func.func @transform_3(%arg0: i32) -> (i32, i32) {
    %c0_i32 = arith.constant 0 : i32
    %c0_i32_0 = arith.constant 0 : i32
    %c0_i32_1 = arith.constant 0 : i32
    return %c0_i32, %c0_i32_0 : i32, i32
  }
  func.func @transform_4(%arg0: i32) -> (i32, i32) {
    %c0_i32 = arith.constant 0 : i32
    %c0_i32_0 = arith.constant 0 : i32
    %c0_i32_1 = arith.constant 0 : i32
    return %c0_i32, %c0_i32_0 : i32, i32
  }
}

</mosaic_0001>

<bundles_post_ra>
// kernel: tpu_custom_call.1
= control target key start
LH: loop header
LB: loop body
LE: loop exit
PB: predicated region body
PF: predicated region fallthrough
CT: control target
= control target key end

     0   :  { %9 = vsyncpa [#allocation3], 0  ;;  %s1529_s0 = inlined_call_operand.hbm [shape: f32[16,32], index: 0, kind: input, shape index: {}]   ;;  %s1530_s1 = inlined_call_operand.hbm [shape: f32[32,128], index: 1, kind: input, shape index: {}]   ;;  %s1531_s2 = inlined_call_operand.hbm [shape: f32[32,128], index: 2, kind: input, shape index: {}]   ;;  %s1532_s3 = inlined_call_operand.vmem [shape: f32[1,128], index: 3, kind: input, shape index: {}]   ;;  %s1533_s4 = inlined_call_operand.hbm [shape: f32[2,32], index: 4, kind: output, shape index: {}]  }
   0x1   :  { %10 = vsyncpa [#allocation6], 0 }
   0x2   :  { %11 = vsyncpa [#allocation4], 0  ;;  %s1337_s15 = smov [#allocation5]   ;;  %s1338_s17 = smov [#allocation2]  }
   0x3   :  { %s29_s16 = sshll.u32 %s1337_s15, 4  ;;  %s17_s18 = sshll.u32 %s1338_s17, 4  ;;  %s30_s16 = int_to_ptr.vmem [resolvable:$true] %s29_s16  ;;  %s18_s18 = int_to_ptr.vmem [resolvable:$true] %s17_s18 }
   0x4   :  { %s1259_s19 = scalar_lea.vmem %s30_s16, 512  ;;  %p1264_p1 = scmp.lt.s32.totalorder %s30_s16, %s30_s16 }
   0x5   :  { %p1260_p0 = scmp.ne.s32.totalorder %s30_s16, %s1259_s19  ;;  %p1265_p2 = scmp.lt.s32.totalorder %s1259_s19, %s1259_s19 }
   0x7   :  { %p1266_p3 = por %p1265_p2, %p1264_p1 }
   0x9   :  { %p1267_p4 = pnand %p1266_p3, %p1260_p0 }
   0xb   :  { %1270 = shalt.err (!%p1267_p4)
}
   0xc   :  { %s1339_s20 = smov 128   ;;  %s1340_s21 = smov 8  }
   0xd   :  { %35 = dma.hbm_to_vmem [thread:$0]  %s1530_s1, 512, %s30_s16, [#allocation6], %s1339_s20, %s1339_s20, %s1340_s21  }
   0xe   :  { %s1279_s24 = scalar_lea.vmem %s18_s18, 256  ;;  %p1284_p6 = scmp.lt.s32.totalorder %s18_s18, %s18_s18 }
   0xf   :  { %p1280_p5 = scmp.ne.s32.totalorder %s18_s18, %s1279_s24  ;;  %p1285_p7 = scmp.lt.s32.totalorder %s1279_s24, %s1279_s24 }
  0x11   :  { %p1286_p8 = por %p1285_p7, %p1284_p6 }
  0x13   :  { %p1287_p9 = pnand %p1286_p8, %p1280_p5 }
  0x15   :  { %1290 = shalt.err (!%p1287_p9)
}
  0x16   :  { %23 = dma.hbm_to_vmem [thread:$0]  %s1529_s0, 256, %s18_s18, [#allocation3], %s1339_s20, %s1339_s20, %s1340_s21  }
  0x17   :  { %s1341_s27 = smov [#allocation7]  }
  0x18   :  { %s41_s28 = sshll.u32 %s1341_s27, 4  ;;  %s42_s28 = int_to_ptr.vmem [resolvable:$true] %s41_s28 }
  0x19   :  { %s1299_s29 = scalar_lea.vmem %s42_s28, 512  ;;  %p1304_p11 = scmp.lt.s32.totalorder %s42_s28, %s42_s28 }
  0x1a   :  { %p1300_p10 = scmp.ne.s32.totalorder %s42_s28, %s1299_s29  ;;  %p1305_p12 = scmp.lt.s32.totalorder %s1299_s29, %s1299_s29 }
  0x1c   :  { %p1306_p13 = por %p1305_p12, %p1304_p11 }
  0x1e   :  { %p1307_p0 = pnand %p1306_p13, %p1300_p10 }
  0x20   :  { %1310 = shalt.err (!%p1307_p0)
}
  0x21   :  { %47 = dma.hbm_to_vmem [thread:$0]  %s1531_s2, 512, %s42_s28, [#allocation6], %s1339_s20, %s1339_s20, %s1340_s21  }
  0x22   :  { %1331 = dma.done.wait [#allocation3], 256  }
  0x23   :  { %1332 = vsyncadd [#allocation3], 4294967040 }
  0x24   :  { %1333 = dma.done.wait [#allocation6], 1024  }
  0x25   :  { %1334 = vsyncadd [#allocation6], 4294966272  ;;  %v1342_v0 = vmov 0.0   ;;  %vm1343_vm0 = vmmov 0   ;;  %v64_v1 = vld [vmem:[#allocation5 + $0x18] sm:$0xff]  ;;  %v63_v2 = vld [vmem:[#allocation5 + $0x10] sm:$0xff] }
  0x26   :  { %1089 = vmatprep.subr.mxu1 %v1342_v0  ;;  %1097 = vmatprep.mubr.msk.f32.mxu1 %vm1343_vm0, %v1342_v0  ;;  %v1384_v3 = vld [vmem:[#allocation7 + $0x18] sm:$0xff]  ;;  %v1387_v4 = vld [vmem:[#allocation7 + $0x10] sm:$0xff]  ;;  %v62_v5 = vld [vmem:[#allocation5 + $0x8] sm:$0xff]  ;;  %vm72_vm1 = vcmask 261120   ;;  %s1344_s5 = smov 64   ;;  %s1346_s6 = smov [#allocation8]  }
  0x27   :  { %1078 = vmatprep.subr.mxu0 %v64_v1  ;;  %1090 = vmatpush3.msra.mxu1 %v1384_v3  ;;  %v59_v6 = vld [vmem:[#allocation2] sm:$0xff]  ;;  %v1391_v7 = vld [vmem:[#allocation7 + $0x8] sm:$0xff]  ;;  %v61_v8 = vld [vmem:[#allocation5] sm:$0xff]  ;;  %s1012_s7 = sshll.u32 %s1346_s6, 4  ;;  %vm1004_vm2 = vcmask 261126   ;;  %s1013_s7 = int_to_ptr.vmem [resolvable:$true] %s1012_s7 }
  0x28   :  { %1079 = vmatpush3.msra.mxu0 %v64_v1  ;;  %1091 = vmatprep.subr.mxu1 %v1342_v0  ;;  %v1395_v9 = vld [vmem:[#allocation7] sm:$0xff]  ;;  %v60_v10 = vld [vmem:[#allocation2 + $0x8] sm:$0xff]  ;;  %v1022_v11 = vld [vmem:[%s1532_s3] ss:$0 sm:$0xff]  ;;  %s1345_s3 = smov 32   ;;  %s1311_s8 = scalar_lea.vmem %s1013_s7, 32 }
  0x29   :  { %1080 = vmatprep.subr.mxu0 %v63_v2  ;;  %1092 = vmatpush3.msra.mxu1 %v1387_v4  ;;  %p1312_p1 = scmp.ne.s32.totalorder %s1013_s7, %s1311_s8  ;;  %p1316_p2 = scmp.lt.s32.totalorder %s1013_s7, %s1013_s7 }
  0x2a   :  { %1081 = vmatpush3.msra.mxu0 %v63_v2  ;;  %1093 = vmatprep.subr.mxu1 %v1342_v0  ;;  %p1317_p3 = scmp.lt.s32.totalorder %s1311_s8, %s1311_s8 }
  0x2b   :  { %1082 = vmatprep.subr.mxu0 %v62_v5  ;;  %1086 = vmatprep.mubr.msk.f32.mxu0 %vm72_vm1, %v59_v6 }
  0x2c   :  { %1083 = vmatpush3.msra.mxu0 %v62_v5  ;;  %1094 = vmatpush3.msra.mxu1 %v1391_v7  ;;  %p1318_p4 = por %p1317_p3, %p1316_p2 }
  0x2d   :  { %1084 = vmatprep.subr.mxu0 %v61_v8  ;;  %1095 = vmatprep.subr.mxu1 %v1342_v0 }
  0x2e   :  { %1085 = vmatpush3.msra.mxu0 %v61_v8  ;;  %1096 = vmatpush3.msra.mxu1 %v1395_v9  ;;  %p1319_p5 = pnand %p1318_p4, %p1312_p1 }
  0x2f   :  { %1087 = vmatmul.mubr.msk.f32.vlgmr.msra.gmra.mxu0 %vm72_vm1, %v60_v10  ;;  %1098 = vmatmul.mubr.f32.vlgmr.msra.gmra.mxu1 %v1342_v0 }
  0x30   :  { %1100 = vmatprep.subr.mxu0 %v1342_v0  ;;  %1108 = vmatprep.mubr.msk.f32.mxu0 %vm1343_vm0, %v1342_v0 }
  0x31   :  { %1101 = vmatpush3.msra.mxu0 %v1384_v3  ;;  %1111 = vmatprep.subr.mxu1 %v1342_v0 }
  0x32   :  { %1102 = vmatprep.subr.mxu0 %v1342_v0  ;;  %1112 = vmatpush3.msra.mxu1 %v1384_v3 }
  0x33   :  { %1103 = vmatpush3.msra.mxu0 %v1387_v4  ;;  %1113 = vmatprep.subr.mxu1 %v1342_v0 }
  0x34   :  { %1104 = vmatprep.subr.mxu0 %v1342_v0  ;;  %1114 = vmatpush3.msra.mxu1 %v1387_v4 }
  0x35   :  { %1105 = vmatpush3.msra.mxu0 %v1391_v7  ;;  %1115 = vmatprep.subr.mxu1 %v1342_v0 }
  0x36   :  { %1106 = vmatprep.subr.mxu0 %v1342_v0  ;;  %1116 = vmatpush3.msra.mxu1 %v1391_v7 }
  0x37   :  { %1107 = vmatpush3.msra.mxu0 %v1395_v9  ;;  %1117 = vmatprep.subr.mxu1 %v1342_v0 }
  0x38   :  { %1118 = vmatpush3.msra.mxu1 %v1395_v9  ;;  %1119 = vmatprep.mubr.msk.f32.mxu1 %vm1343_vm0, %v1342_v0 }
  0x39   :  { %1122 = vmatprep.subr.mxu0 %v1342_v0  ;;  %1133 = vmatprep.subr.mxu1 %v1342_v0 }
  0xef   :  { %v1088_v12 = vpop.f32.mrf.mxu0  ;;  %v227_v13 = vpop.f32.mrf.mxu1 }
  0xf0   :  { %v1427_v14 = vadd.f32 %v1088_v12, %v1022_v11 }
  0xf1   :  { %v145_v15 = vpop.f32.mrf.mxu0  ;;  %v1099_v16 = vpop.f32.mrf.mxu1 }
  0xf2   :  { %v1429_v17 = vadd.f32 %v1022_v11, %v145_v15 }
  0xf4   :  { %v231_v18 = vadd.f32 %v227_v13, %v1429_v17 }
  0xf6   :  { %1187 = vtanh.f32 %v231_v18  ;;  %v232_v20 = vsub.f32 0.0, %v231_v18 }
  0xf8   :  { %v233_v21 = vmul.f32 1.442695, %v232_v20 }
  0xfa   :  { %1189 = vpow2.f32 %v233_v21 }
 0x103   :  { %v1188_v19 = vpop.eup %1187 }
 0x104   :  { %241 = vrot.lane.b32.xlu0 %v1188_v19, %s1344_s5 }
 0x107   :  { %v1190_v22 = vpop.eup %1189 }
 0x108   :  { %v235_v23 = vadd.f32 1.0, %v1190_v22 }
 0x10a   :  { %1191 = vrcp.f32 %v235_v23 }
 0x117   :  { %v1192_v24 = vpop.eup %1191 }
 0x118   :  { %v239_v27 = vmul.f32 0.0, %v1192_v24 }
 0x176   :  { %v242_v25 = vpop.permute.xlu0 %241 }
 0x177   :  { %v244_v26 = vmul.f32 %v1192_v24, %v242_v25 }
 0x179   :  { %246 = vrot.lane.b32.xlu0 %v244_v26, %s1345_s3 }
 0x1eb   :  { %v247_v28 = vpop.permute.xlu0 %246 }
 0x1ec   :  { %v249_v29 = vadd.f32 %v247_v28, %v239_v27 }
 0x1ee   :  { %1193 = vtanh.f32 %v249_v29  ;;  %v343_v46 = vrot.slane %v249_v29, 6 }
 0x1fb   :  { %v1194_v30 = vpop.eup %1193 }
 0x1fc   :  { %252 = vrot.lane.b32.xlu1 %v1194_v30, %s1344_s5 }
 0x26e   :  { %v253_v31 = vpop.permute.xlu1 %252 }
 0x26f   :  { %v255_v32 = vmul.f32 %v1192_v24, %v253_v31 }
 0x271   :  { %257 = vrot.lane.b32.xlu1 %v255_v32, %s1345_s3 }
 0x2e3   :  { %v258_v33 = vpop.permute.xlu1 %257 }
 0x2e4   :  { %1109 = vmatmul.mubr.msk.f32.vlgmr.msra.gmra.mxu0 %vm72_vm1, %v258_v33 }
 0x2e5   :  { %1123 = vmatpush3.msra.mxu0 %v1384_v3  ;;  %1130 = vmatprep.mubr.msk.f32.mxu0 %vm1343_vm0, %v1342_v0 }
 0x2e6   :  { %1124 = vmatprep.subr.mxu0 %v1342_v0 }
 0x2e7   :  { %1125 = vmatpush3.msra.mxu0 %v1387_v4 }
 0x2e8   :  { %1126 = vmatprep.subr.mxu0 %v1342_v0 }
 0x2e9   :  { %1127 = vmatpush3.msra.mxu0 %v1391_v7 }
 0x2ea   :  { %1128 = vmatprep.subr.mxu0 %v1342_v0 }
 0x2eb   :  { %1129 = vmatpush3.msra.mxu0 %v1395_v9 }
 0x2ec   :  { %1144 = vmatprep.subr.mxu0 %v1342_v0 }
 0x3a4   :  { %v327_v34 = vpop.f32.mrf.mxu0 }
 0x3a5   :  { %v332_v35 = vrot.slane %v327_v34, 6 }
 0x3a6   :  { %v1110_v36 = vpop.f32.mrf.mxu0 }
 0x3a7   :  { %v334_v37 = vadd.f32 %v332_v35, %v1429_v17 }
 0x3a9   :  { %1195 = vtanh.f32 %v334_v37  ;;  %v335_v39 = vsub.f32 0.0, %v334_v37 }
 0x3ab   :  { %v336_v40 = vmul.f32 1.442695, %v335_v39 }
 0x3ad   :  { %1197 = vpow2.f32 %v336_v40 }
 0x3b6   :  { %v1196_v38 = vpop.eup %1195 }
 0x3b7   :  { %347 = vrot.lane.b32.xlu0 %v1196_v38, %s1344_s5 }
 0x3ba   :  { %v1198_v41 = vpop.eup %1197 }
 0x3bb   :  { %v338_v42 = vadd.f32 1.0, %v1198_v41 }
 0x3bd   :  { %1199 = vrcp.f32 %v338_v42 }
 0x3ca   :  { %v1200_v43 = vpop.eup %1199 }
 0x3cb   :  { %v345_v47 = vmul.f32 %v1200_v43, %v343_v46 }
 0x429   :  { %v348_v44 = vpop.permute.xlu0 %347 }
 0x42a   :  { %v350_v45 = vmul.f32 %v1200_v43, %v348_v44 }
 0x42c   :  { %352 = vrot.lane.b32.xlu1 %v350_v45, %s1345_s3 }
 0x49e   :  { %v353_v48 = vpop.permute.xlu1 %352 }
 0x49f   :  { %v355_v49 = vadd.f32 %v353_v48, %v345_v47 }
 0x4a1   :  { %1201 = vtanh.f32 %v355_v49  ;;  %v450_v6 = vrot.slane %v355_v49, 6 }
 0x4ae   :  { %v1202_v50 = vpop.eup %1201 }
 0x4af   :  { %358 = vrot.lane.b32.xlu0 %v1202_v50, %s1344_s5 }
 0x521   :  { %v359_v51 = vpop.permute.xlu0 %358 }
 0x522   :  { %v361_v52 = vmul.f32 %v1200_v43, %v359_v51 }
 0x524   :  { %v363_v53 = vrot.slane %v361_v52, 2 }
 0x526   :  { %364 = vrot.lane.b32.xlu1 %v363_v53, %s1345_s3 }
 0x598   :  { %v365_v54 = vpop.permute.xlu1 %364 }
 0x599   :  { %1120 = vmatmul.mubr.msk.f32.vlgmr.msra.gmra.mxu1 %vm72_vm1, %v365_v54 }
 0x59a   :  { %1134 = vmatpush3.msra.mxu1 %v1384_v3  ;;  %1141 = vmatprep.mubr.msk.f32.mxu1 %vm1343_vm0, %v1342_v0 }
 0x59b   :  { %1135 = vmatprep.subr.mxu1 %v1342_v0 }
 0x59c   :  { %1136 = vmatpush3.msra.mxu1 %v1387_v4 }
 0x59d   :  { %1137 = vmatprep.subr.mxu1 %v1342_v0 }
 0x59e   :  { %1138 = vmatpush3.msra.mxu1 %v1391_v7 }
 0x59f   :  { %1139 = vmatprep.subr.mxu1 %v1342_v0 }
 0x5a0   :  { %1140 = vmatpush3.msra.mxu1 %v1395_v9 }
 0x5a1   :  { %1155 = vmatprep.subr.mxu1 %v1342_v0 }
 0x659   :  { %v434_v55 = vpop.f32.mrf.mxu1 }
 0x65a   :  { %v439_v56 = vrot.slane %v434_v55, 4 }
 0x65b   :  { %v1121_v57 = vpop.f32.mrf.mxu1 }
 0x65c   :  { %v441_v58 = vadd.f32 %v439_v56, %v1429_v17 }
 0x65e   :  { %1203 = vtanh.f32 %v441_v58  ;;  %v442_v60 = vsub.f32 0.0, %v441_v58 }
 0x660   :  { %v443_v61 = vmul.f32 1.442695, %v442_v60 }
 0x662   :  { %1205 = vpow2.f32 %v443_v61 }
 0x66b   :  { %v1204_v59 = vpop.eup %1203 }
 0x66c   :  { %454 = vrot.lane.b32.xlu0 %v1204_v59, %s1344_s5 }
 0x66f   :  { %v1206_v62 = vpop.eup %1205 }
 0x670   :  { %v445_v63 = vadd.f32 1.0, %v1206_v62 }
 0x672   :  { %1207 = vrcp.f32 %v445_v63 }
 0x67f   :  { %v1208_v1 = vpop.eup %1207 }
 0x680   :  { %v452_v8 = vmul.f32 %v1208_v1, %v450_v6 }
 0x6de   :  { %v455_v2 = vpop.permute.xlu0 %454 }
 0x6df   :  { %v457_v5 = vmul.f32 %v1208_v1, %v455_v2 }
 0x6e1   :  { %459 = vrot.lane.b32.xlu1 %v457_v5, %s1345_s3 }
 0x753   :  { %v460_v10 = vpop.permute.xlu1 %459 }
 0x754   :  { %v462_v11 = vadd.f32 %v460_v10, %v452_v8 }
 0x756   :  { %1209 = vtanh.f32 %v462_v11  ;;  %v557_v31 = vrot.slane %v462_v11, 6 }
 0x763   :  { %v1210_v12 = vpop.eup %1209 }
 0x764   :  { %465 = vrot.lane.b32.xlu0 %v1210_v12, %s1344_s5 }
 0x7d6   :  { %v466_v13 = vpop.permute.xlu0 %465 }
 0x7d7   :  { %v468_v15 = vmul.f32 %v1208_v1, %v466_v13 }
 0x7d9   :  { %v470_v16 = vrot.slane %v468_v15, 4 }
 0x7db   :  { %471 = vrot.lane.b32.xlu1 %v470_v16, %s1345_s3 }
 0x84d   :  { %v472_v18 = vpop.permute.xlu1 %471 }
 0x84e   :  { %1131 = vmatmul.mubr.msk.f32.vlgmr.msra.gmra.mxu0 %vm72_vm1, %v472_v18 }
 0x84f   :  { %1145 = vmatpush3.msra.mxu0 %v1384_v3  ;;  %1152 = vmatprep.mubr.msk.f32.mxu0 %vm1343_vm0, %v1342_v0 }
 0x850   :  { %1146 = vmatprep.subr.mxu0 %v1342_v0 }
 0x851   :  { %1147 = vmatpush3.msra.mxu0 %v1387_v4 }
 0x852   :  { %1148 = vmatprep.subr.mxu0 %v1342_v0 }
 0x853   :  { %1149 = vmatpush3.msra.mxu0 %v1391_v7 }
 0x854   :  { %1150 = vmatprep.subr.mxu0 %v1342_v0 }
 0x855   :  { %1151 = vmatpush3.msra.mxu0 %v1395_v9 }
 0x856   :  { %1166 = vmatprep.subr.mxu0 %v1342_v0 }
 0x90e   :  { %v541_v19 = vpop.f32.mrf.mxu0 }
 0x90f   :  { %v546_v20 = vrot.slane %v541_v19, 2 }
 0x910   :  { %v1132_v21 = vpop.f32.mrf.mxu0 }
 0x911   :  { %v548_v22 = vadd.f32 %v546_v20, %v1429_v17 }
 0x913   :  { %1211 = vtanh.f32 %v548_v22  ;;  %v549_v24 = vsub.f32 0.0, %v548_v22 }
 0x915   :  { %v550_v25 = vmul.f32 1.442695, %v549_v24 }
 0x917   :  { %1213 = vpow2.f32 %v550_v25 }
 0x920   :  { %v1212_v23 = vpop.eup %1211 }
 0x921   :  { %561 = vrot.lane.b32.xlu0 %v1212_v23, %s1344_s5 }
 0x924   :  { %v1214_v26 = vpop.eup %1213 }
 0x925   :  { %v552_v27 = vadd.f32 1.0, %v1214_v26 }
 0x927   :  { %1215 = vrcp.f32 %v552_v27 }
 0x934   :  { %v1216_v28 = vpop.eup %1215 }
 0x935   :  { %v559_v32 = vmul.f32 %v1216_v28, %v557_v31 }
 0x993   :  { %v562_v29 = vpop.permute.xlu0 %561 }
 0x994   :  { %v564_v30 = vmul.f32 %v1216_v28, %v562_v29 }
 0x996   :  { %566 = vrot.lane.b32.xlu1 %v564_v30, %s1345_s3 }
 0xa08   :  { %v567_v33 = vpop.permute.xlu1 %566 }
 0xa09   :  { %v569_v34 = vadd.f32 %v567_v33, %v559_v32 }
 0xa0b   :  { %1217 = vtanh.f32 %v569_v34  ;;  %v661_v50 = vrot.slane %v569_v34, 6 }
 0xa18   :  { %v1218_v17 = vpop.eup %1217 }
 0xa19   :  { %572 = vrot.lane.b32.xlu0 %v1218_v17, %s1344_s5 }
 0xa8b   :  { %v573_v35 = vpop.permute.xlu0 %572 }
 0xa8c   :  { %v575_v36 = vmul.f32 %v1216_v28, %v573_v35 }
 0xa8e   :  { %v577_v37 = vrot.slane %v575_v36, 6 }
 0xa90   :  { %578 = vrot.lane.b32.xlu1 %v577_v37, %s1345_s3 }
 0xb02   :  { %v579_v38 = vpop.permute.xlu1 %578 }
 0xb03   :  { %1142 = vmatmul.mubr.msk.f32.vlgmr.msra.gmra.mxu1 %vm72_vm1, %v579_v38 }
 0xb04   :  { %1156 = vmatpush3.msra.mxu1 %v1384_v3  ;;  %1163 = vmatprep.mubr.msk.f32.mxu1 %vm1343_vm0, %v1342_v0 }
 0xb05   :  { %1157 = vmatprep.subr.mxu1 %v1342_v0 }
 0xb06   :  { %1158 = vmatpush3.msra.mxu1 %v1387_v4 }
 0xb07   :  { %1159 = vmatprep.subr.mxu1 %v1342_v0 }
 0xb08   :  { %1160 = vmatpush3.msra.mxu1 %v1391_v7 }
 0xb09   :  { %1161 = vmatprep.subr.mxu1 %v1342_v0 }
 0xb0a   :  { %1162 = vmatpush3.msra.mxu1 %v1395_v9 }
 0xbc3   :  { %v648_v39 = vpop.f32.mrf.mxu1 }
 0xbc4   :  { %v652_v40 = vadd.f32 %v648_v39, %v1427_v14 }
 0xbc5   :  { %v1143_v41 = vpop.f32.mrf.mxu1 }
 0xbc6   :  { %1219 = vtanh.f32 %v652_v40  ;;  %v653_v43 = vsub.f32 0.0, %v652_v40 }
 0xbc8   :  { %v654_v44 = vmul.f32 1.442695, %v653_v43 }
 0xbca   :  { %1221 = vpow2.f32 %v654_v44 }
 0xbd3   :  { %v1220_v42 = vpop.eup %1219 }
 0xbd4   :  { %665 = vrot.lane.b32.xlu0 %v1220_v42, %s1344_s5 }
 0xbd7   :  { %v1222_v45 = vpop.eup %1221 }
 0xbd8   :  { %v656_v46 = vadd.f32 1.0, %v1222_v45 }
 0xbda   :  { %1223 = vrcp.f32 %v656_v46 }
 0xbe7   :  { %v1224_v47 = vpop.eup %1223 }
 0xbe8   :  { %v663_v51 = vmul.f32 %v1224_v47, %v661_v50 }
 0xc46   :  { %v666_v48 = vpop.permute.xlu0 %665 }
 0xc47   :  { %v668_v49 = vmul.f32 %v1224_v47, %v666_v48 }
 0xc49   :  { %670 = vrot.lane.b32.xlu1 %v668_v49, %s1345_s3 }
 0xcbb   :  { %v671_v52 = vpop.permute.xlu1 %670 }
 0xcbc   :  { %v673_v53 = vadd.f32 %v671_v52, %v663_v51 }
 0xcbe   :  { %1225 = vtanh.f32 %v673_v53 }
 0xccb   :  { %v1226_v54 = vpop.eup %1225 }
 0xccc   :  { %676 = vrot.lane.b32.xlu0 %v1226_v54, %s1344_s5 }
 0xd3e   :  { %v677_v55 = vpop.permute.xlu0 %676 }
 0xd3f   :  { %v679_v56 = vmul.f32 %v1224_v47, %v677_v55 }
 0xd41   :  { %681 = vrot.lane.b32.xlu1 %v679_v56, %s1345_s3 }
 0xdb3   :  { %v682_v57 = vpop.permute.xlu1 %681 }
 0xdb4   :  { %1153 = vmatmul.mubr.msk.f32.vlgmr.msra.gmra.mxu0 %vm72_vm1, %v682_v57 }
 0xdb5   :  { %1167 = vmatpush3.msra.mxu0 %v1384_v3  ;;  %1174 = vmatprep.mubr.msk.f32.mxu0 %vm1343_vm0, %v1342_v0 }
 0xdb6   :  { %1168 = vmatprep.subr.mxu0 %v1342_v0 }
 0xdb7   :  { %1169 = vmatpush3.msra.mxu0 %v1387_v4 }
 0xdb8   :  { %1170 = vmatprep.subr.mxu0 %v1342_v0 }
 0xdb9   :  { %1171 = vmatpush3.msra.mxu0 %v1391_v7 }
 0xdba   :  { %1172 = vmatprep.subr.mxu0 %v1342_v0 }
 0xdbb   :  { %1173 = vmatpush3.msra.mxu0 %v1395_v9  ;;  %v767_v9 = vrot.slane %v673_v53, 6 }
 0xe74   :  { %v751_v58 = vpop.f32.mrf.mxu0 }
 0xe75   :  { %v756_v59 = vrot.slane %v751_v58, 6 }
 0xe76   :  { %v1154_v60 = vpop.f32.mrf.mxu0 }
 0xe77   :  { %v758_v3 = vadd.f32 %v756_v59, %v1427_v14 }
 0xe79   :  { %1227 = vtanh.f32 %v758_v3  ;;  %v759_v62 = vsub.f32 0.0, %v758_v3 }
 0xe7b   :  { %v760_v63 = vmul.f32 1.442695, %v759_v62 }
 0xe7d   :  { %1229 = vpow2.f32 %v760_v63 }
 0xe86   :  { %v1228_v61 = vpop.eup %1227 }
 0xe87   :  { %771 = vrot.lane.b32.xlu0 %v1228_v61, %s1344_s5 }
 0xe8a   :  { %v1230_v4 = vpop.eup %1229 }
 0xe8b   :  { %v762_v1 = vadd.f32 1.0, %v1230_v4 }
 0xe8d   :  { %1231 = vrcp.f32 %v762_v1 }
 0xe9a   :  { %v1232_v7 = vpop.eup %1231 }
 0xe9b   :  { %v769_v5 = vmul.f32 %v1232_v7, %v767_v9 }
 0xef9   :  { %v772_v2 = vpop.permute.xlu0 %771 }
 0xefa   :  { %v774_v0 = vmul.f32 %v1232_v7, %v772_v2 }
 0xefc   :  { %776 = vrot.lane.b32.xlu1 %v774_v0, %s1345_s3 }
 0xf6e   :  { %v777_v6 = vpop.permute.xlu1 %776 }
 0xf6f   :  { %v779_v8 = vadd.f32 %v777_v6, %v769_v5 }
 0xf71   :  { %1233 = vtanh.f32 %v779_v8  ;;  %v874_v29 = vrot.slane %v779_v8, 6 }
 0xf7e   :  { %v1234_v10 = vpop.eup %1233 }
 0xf7f   :  { %782 = vrot.lane.b32.xlu0 %v1234_v10, %s1344_s5 }
 0xff1   :  { %v783_v11 = vpop.permute.xlu0 %782 }
 0xff2   :  { %v785_v12 = vmul.f32 %v1232_v7, %v783_v11 }
 0xff4   :  { %v787_v13 = vrot.slane %v785_v12, 2 }
 0xff6   :  { %788 = vrot.lane.b32.xlu1 %v787_v13, %s1345_s3 }
0x1068   :  { %v789_v15 = vpop.permute.xlu1 %788 }
0x1069   :  { %1164 = vmatmul.mubr.msk.f32.vlgmr.msra.gmra.mxu1 %vm72_vm1, %v789_v15 }
0x1129   :  { %v858_v16 = vpop.f32.mrf.mxu1 }
0x112a   :  { %v863_v18 = vrot.slane %v858_v16, 4 }
0x112b   :  { %v1165_v19 = vpop.f32.mrf.mxu1 }
0x112c   :  { %v865_v20 = vadd.f32 %v863_v18, %v1427_v14 }
0x112e   :  { %1235 = vtanh.f32 %v865_v20  ;;  %v866_v22 = vsub.f32 0.0, %v865_v20 }
0x1130   :  { %v867_v23 = vmul.f32 1.442695, %v866_v22 }
0x1132   :  { %1237 = vpow2.f32 %v867_v23 }
0x113b   :  { %v1236_v21 = vpop.eup %1235 }
0x113c   :  { %878 = vrot.lane.b32.xlu0 %v1236_v21, %s1344_s5 }
0x113f   :  { %v1238_v24 = vpop.eup %1237 }
0x1140   :  { %v869_v25 = vadd.f32 1.0, %v1238_v24 }
0x1142   :  { %1239 = vrcp.f32 %v869_v25 }
0x114f   :  { %v1240_v26 = vpop.eup %1239 }
0x1150   :  { %v876_v30 = vmul.f32 %v1240_v26, %v874_v29 }
0x11ae   :  { %v879_v27 = vpop.permute.xlu0 %878 }
0x11af   :  { %v881_v28 = vmul.f32 %v1240_v26, %v879_v27 }
0x11b1   :  { %883 = vrot.lane.b32.xlu1 %v881_v28, %s1345_s3 }
0x1223   :  { %v884_v31 = vpop.permute.xlu1 %883 }
0x1224   :  { %v886_v32 = vadd.f32 %v884_v31, %v876_v30 }
0x1226   :  { %1241 = vtanh.f32 %v886_v32  ;;  %v981_v49 = vrot.slane %v886_v32, 6 }
0x1233   :  { %v1242_v33 = vpop.eup %1241 }
0x1234   :  { %889 = vrot.lane.b32.xlu0 %v1242_v33, %s1344_s5 }
0x12a6   :  { %v890_v34 = vpop.permute.xlu0 %889 }
0x12a7   :  { %v892_v17 = vmul.f32 %v1240_v26, %v890_v34 }
0x12a9   :  { %v894_v35 = vrot.slane %v892_v17, 4 }
0x12ab   :  { %895 = vrot.lane.b32.xlu1 %v894_v35, %s1345_s3 }
0x131d   :  { %v896_v36 = vpop.permute.xlu1 %895 }
0x131e   :  { %1175 = vmatmul.mubr.msk.f32.vlgmr.msra.gmra.mxu0 %vm72_vm1, %v896_v36 }
0x13de   :  { %v965_v37 = vpop.f32.mrf.mxu0 }
0x13df   :  { %v970_v38 = vrot.slane %v965_v37, 2 }
0x13e0   :  { %v1176_v39 = vpop.f32.mrf.mxu0 }
0x13e1   :  { %v972_v40 = vadd.f32 %v970_v38, %v1427_v14 }
0x13e3   :  { %1243 = vtanh.f32 %v972_v40  ;;  %v973_v42 = vsub.f32 0.0, %v972_v40 }
0x13e5   :  { %v974_v43 = vmul.f32 1.442695, %v973_v42 }
0x13e7   :  { %1245 = vpow2.f32 %v974_v43 }
0x13f0   :  { %v1244_v41 = vpop.eup %1243 }
0x13f1   :  { %985 = vrot.lane.b32.xlu0 %v1244_v41, %s1344_s5 }
0x13f4   :  { %v1246_v44 = vpop.eup %1245 }
0x13f5   :  { %v976_v45 = vadd.f32 1.0, %v1246_v44 }
0x13f7   :  { %1247 = vrcp.f32 %v976_v45 }
0x1404   :  { %v1248_v46 = vpop.eup %1247 }
0x1405   :  { %v983_v50 = vmul.f32 %v1248_v46, %v981_v49 }
0x1463   :  { %v986_v47 = vpop.permute.xlu0 %985 }
0x1464   :  { %v988_v48 = vmul.f32 %v1248_v46, %v986_v47 }
0x1466   :  { %990 = vrot.lane.b32.xlu1 %v988_v48, %s1345_s3 }
0x14d8   :  { %v991_v51 = vpop.permute.xlu1 %990 }
0x14d9   :  { %v993_v52 = vadd.f32 %v991_v51, %v983_v50 }
0x14db   :  { %1249 = vtanh.f32 %v993_v52 }
0x14e8   :  { %v1250_v14 = vpop.eup %1249 }
0x14e9   :  { %996 = vrot.lane.b32.xlu0 %v1250_v14, %s1344_s5 }
0x155b   :  { %v997_v53 = vpop.permute.xlu0 %996 }
0x155c   :  { %v999_v54 = vmul.f32 %v1248_v46, %v997_v53 }
0x155e   :  { %1001 = vrot.lane.b32.xlu1 %v999_v54, %s1345_s3 }
0x15d0   :  { %v1002_v55 = vpop.permute.xlu1 %1001 }
0x15d1   :  { %1005 = vst.msk [vmem:[#allocation8 - $0x6] sm:$0xc0] %vm1004_vm2, %v1002_v55 }
0x15d2   :  { %1322 = shalt.err (!%p1319_p5)
}
0x15d3   :  { %1015 = dma.vmem_to_hbm [thread:$0]  %s1013_s7, 32, %s1533_s4, [#allocation4]  }
0x15d4   :  { %1335 = dma.done.wait [#allocation4], 32  }
0x15d5   :  { %1336 = vsyncadd [#allocation4], 4294967264 }
0x15d6   :  { %1019 = vsyncpa [#allocation3], 1 }
0x15d7   :  { %1020 = vsyncpa [#allocation6], 1 }
0x15d8   :  { %1021 = vsyncpa [#allocation4], 1 }

</bundles_post_ra>
